<compile_context>
chip_gen: v5e
topology: v5e:2x2
jax: 0.10.0
libtpu: 0.0.40
codegen_flags: <defaults>
</compile_context>

<pallas_src>
import functools

import jax
import jax.numpy as jnp
from jax.experimental import pallas as pl
from jax.experimental.pallas import tpu as pltpu

HIDDEN = 256
OUTPUT = 256
_SUB = 8
_LANE = 128


def _round_up(n, m):
    return ((n + m - 1) // m) * m


def _cdiv(a, b):
    return (a + b - 1) // b


def _vmem_capacity_bytes():
    try:
        cap = int(getattr(pltpu.get_tpu_info(), "vmem_capacity_bytes", 0))
        if cap > 0:
            return cap
    except Exception:
        pass
    return 64 << 20  # conservative fallback: v7x per-TensorCore VMEM


def _tensorcores_per_device():
    try:
        kind = jax.devices()[0].device_kind.lower()
    except Exception:
        return 1
    # Single-TC chips: v5e ("v5 lite"), v6e ("v6 lite").  v4 / v5p / v7x expose 2 TCs.
    if "lite" in kind or "v5e" in kind or "v6e" in kind:
        return 1
    return 2


def _pick_block_b(B, block_b, footprint, budget):
    n_steps = max(1, _cdiv(B, block_b))
    # Only split a single step in two when the chip actually has 2 TensorCores and
    # each half stays big enough (>=128 rows) to amortize per-step overhead.
    if n_steps == 1 and _tensorcores_per_device() >= 2 and B >= 256:
        n_steps = 2
    # Balanced tiles: never pad a ragged batch up to a full block_b multiple.
    bb = max(_SUB, _round_up(_cdiv(B, n_steps), _SUB))
    while footprint(bb) > budget and bb > _SUB:
        bb = max(_SUB, _round_up(bb // 2, _SUB))  # re-round: keep multiple of 8
    if bb >= B:
        bb = B  # full-batch block (exempt from the sublane-multiple rule)
    return bb


def _vmem_limit(footprint_bytes, cap):
    return int(min(cap - (16 << 20), max(32 << 20, footprint_bytes + (8 << 20))))


# --------------------------------------------------------------------------- kernels
def _mlp_kernel(x_ref, w1_ref, b1_ref, w2_ref, b2_ref, o_ref, *, compute_dtype):
    # Layer 1: [bb, D] @ [D, 256] on the MXU (fp32 accumulate) + bias -> ReLU (fp32).
    x = x_ref[...].astype(compute_dtype)          # bf16 cast happens in-kernel
    h = jnp.dot(x, w1_ref[...], preferred_element_type=jnp.float32)
    h = jnp.maximum(h + b1_ref[...], 0.0)
    # Layer 2: cast h to the weight dtype (keeps the bf16 MXU path), fp32 accumulate.
    y = jnp.dot(h.astype(w2_ref.dtype), w2_ref[...], preferred_element_type=jnp.float32)
    y = jnp.maximum(y + b2_ref[...], 0.0)
    o_ref[...] = y.astype(o_ref.dtype)


def _mlp_kernel_ktiled(x_ref, w1_ref, b1_ref, w2_ref, b2_ref, o_ref, h_acc,
                       *, compute_dtype):
    k = pl.program_id(1)

    @pl.when(k == 0)
    def _():
        h_acc[...] = jnp.zeros_like(h_acc)

    x = x_ref[...].astype(compute_dtype)
    h_acc[...] += jnp.dot(x, w1_ref[...], preferred_element_type=jnp.float32)

    @pl.when(k == pl.num_programs(1) - 1)
    def _():
        h = jnp.maximum(h_acc[...] + b1_ref[...], 0.0)
        y = jnp.dot(h.astype(w2_ref.dtype), w2_ref[...],
                    preferred_element_type=jnp.float32)
        o_ref[...] = jnp.maximum(y + b2_ref[...], 0.0).astype(o_ref.dtype)


# --------------------------------------------------------------------------- wrapper
@functools.partial(jax.jit,
                   static_argnames=("block_b", "block_d", "use_bf16", "out_dtype"))
def two_layer_256_relu(x, w1_t, b1, w2_t, b2, *, block_b=512, block_d=None,
                       use_bf16=True, out_dtype=jnp.float32):
    """x: [B, D]; w1_t: [D, 256]; b1: [1, 256]; w2_t: [256, 256]; b2: [1, 256]."""
    B, D = x.shape
    assert w1_t.shape == (D, HIDDEN)
    assert w2_t.shape == (HIDDEN, OUTPUT)

    compute_dtype = jnp.bfloat16 if use_bf16 else jnp.float32
    w_itemsize = 2 if use_bf16 else 4
    x_itemsize = x.dtype.itemsize
    out_itemsize = 2 if out_dtype == jnp.bfloat16 else 4

    cap = _vmem_capacity_bytes()
    if cap >= (96 << 20):                               # v5e / v6e: 128 MiB physical
        tile_budget = int(cap * 0.70)
    else:                                               # v7x: 64 MiB per TensorCore
        tile_budget = max(cap // 2 - (8 << 20), 16 << 20)

    # Decide whether W1 can stay fully VMEM-resident or must be streamed over a
    # K (feature) grid axis -- the large-D scaling cliff on v7x's 64 MiB VMEM.
    if block_d is None and 2 * D * HIDDEN * w_itemsize > tile_budget // 2:
        block_d = 512
    k_tiled = block_d is not None

    b1_p = b1.reshape(1, HIDDEN).astype(jnp.float32)
    b2_p = b2.reshape(1, OUTPUT).astype(jnp.float32)
    w2_p = w2_t.astype(compute_dtype)

    if not k_tiled:
        # ---------------- resident-W1 path: no pad/cast of x in the wrapper --------
        x_in = x
        w1_in = w1_t.astype(compute_dtype)   # weights are small; one-time cast

        def footprint(tb):
            return (2 * tb * D * x_itemsize             # x tile (double-buffered)
                    + 2 * tb * OUTPUT * out_itemsize    # out tile
                    + 2 * D * HIDDEN * w_itemsize       # W1 (resident, 2 buffers)
                    + 2 * HIDDEN * OUTPUT * w_itemsize  # W2
                    + tb * HIDDEN * 4                   # fp32 hidden
                    + tb * (D + HIDDEN) * w_itemsize    # bf16 copies of x / h
                    + tb * OUTPUT * 4)                  # fp32 y before output cast

        bb = _pick_block_b(B, block_b, footprint, tile_budget)
        grid = (_cdiv(B, bb),)

        kernel = functools.partial(_mlp_kernel, compute_dtype=compute_dtype)
        return pl.pallas_call(
            kernel,
            out_shape=jax.ShapeDtypeStruct((B, OUTPUT), out_dtype),
            grid_spec=pltpu.PrefetchScalarGridSpec(
                num_scalar_prefetch=0,
                grid=grid,
                in_specs=[
                    pl.BlockSpec((bb, D), lambda i: (i, 0)),         # x tile (full D)
                    pl.BlockSpec((D, HIDDEN), lambda i: (0, 0)),     # W1^T (resident)
                    pl.BlockSpec((1, HIDDEN), lambda i: (0, 0)),     # b1
                    pl.BlockSpec((HIDDEN, OUTPUT), lambda i: (0, 0)),  # W2^T (resident)
                    pl.BlockSpec((1, OUTPUT), lambda i: (0, 0)),     # b2
                ],
                out_specs=pl.BlockSpec((bb, OUTPUT), lambda i: (i, 0)),
            ),
            compiler_params=pltpu.CompilerParams(
                dimension_semantics=("parallel",),
                vmem_limit_bytes=_vmem_limit(footprint(bb), cap),
            ),
        )(x_in, w1_in, b1_p, w2_p, b2_p)

    # -------------------- K-tiled path: stream W1 in (block_d, 256) blocks ---------
    block_d = _round_up(min(block_d, _round_up(D, _LANE)), _LANE)
    d_pad = _round_up(D, block_d)
    if d_pad != D:
        # K-tiling needs a lane-aligned feature axis; pad (+cast) once here. Zero
        # padding contributes nothing to x @ W1.
        x_in = jnp.pad(x.astype(compute_dtype), ((0, 0), (0, d_pad - D)))
        w1_in = jnp.pad(w1_t.astype(compute_dtype), ((0, d_pad - D), (0, 0)))
        x_bytes = w_itemsize
    else:
        x_in = x
        w1_in = w1_t.astype(compute_dtype)
        x_bytes = x_itemsize

    def footprint(tb):
        return (2 * tb * block_d * x_bytes
                + 2 * block_d * HIDDEN * w_itemsize
                + 2 * HIDDEN * OUTPUT * w_itemsize
                + 2 * tb * OUTPUT * out_itemsize
                + tb * HIDDEN * 4                        # h accumulator scratch
                + tb * (block_d + HIDDEN) * w_itemsize
                + tb * OUTPUT * 4)

    bb = _pick_block_b(B, block_b, footprint, tile_budget)
    grid = (_cdiv(B, bb), d_pad // block_d)              # reduction axis last

    kernel = functools.partial(_mlp_kernel_ktiled, compute_dtype=compute_dtype)
    return pl.pallas_call(
        kernel,
        out_shape=jax.ShapeDtypeStruct((B, OUTPUT), out_dtype),
        grid_spec=pltpu.PrefetchScalarGridSpec(
            num_scalar_prefetch=0,
            grid=grid,
            in_specs=[
                pl.BlockSpec((bb, block_d), lambda i, k: (i, k)),       # x tile
                pl.BlockSpec((block_d, HIDDEN), lambda i, k: (k, 0)),   # W1 block
                pl.BlockSpec((1, HIDDEN), lambda i, k: (0, 0)),         # b1
                pl.BlockSpec((HIDDEN, OUTPUT), lambda i, k: (0, 0)),    # W2 (resident)
                pl.BlockSpec((1, OUTPUT), lambda i, k: (0, 0)),         # b2
            ],
            out_specs=pl.BlockSpec((bb, OUTPUT), lambda i, k: (i, 0)),
            scratch_shapes=[pltpu.VMEM((bb, HIDDEN), jnp.float32)],
        ),
        compiler_params=pltpu.CompilerParams(
            dimension_semantics=("parallel", "arbitrary"),
            vmem_limit_bytes=_vmem_limit(footprint(bb), cap),
        ),
    )(x_in, w1_in, b1_p, w2_p, b2_p)


def init_params(key, input_dim):
    """Deterministic init mimicking nn.Linear's uniform(-1/sqrt(in), 1/sqrt(in))."""
    k1, k2, k3, k4 = jax.random.split(key, 4)
    bound1 = 1.0 / jnp.sqrt(jnp.float32(input_dim))
    bound2 = 1.0 / jnp.sqrt(jnp.float32(HIDDEN))
    # PyTorch weight shape is [out, in]; store transposed [in, out] for the kernel.
    w1_t = jax.random.uniform(k1, (input_dim, HIDDEN), jnp.float32, -bound1, bound1)
    b1 = jax.random.uniform(k2, (1, HIDDEN), jnp.float32, -bound1, bound1)
    w2_t = jax.random.uniform(k3, (HIDDEN, OUTPUT), jnp.float32, -bound2, bound2)
    b2 = jax.random.uniform(k4, (1, OUTPUT), jnp.float32, -bound2, bound2)
    return w1_t, b1, w2_t, b2


if __name__ == "__main__":
    key = jax.random.PRNGKey(0)
    kx, kp, kx2, kp2 = jax.random.split(key, 4)

    def ref_fwd(x, w1_t, b1, w2_t, b2):
        h = jnp.maximum(x @ w1_t + b1, 0.0)
        return jnp.maximum(h @ w2_t + b2, 0.0)

    # Small, deliberately ragged shapes (batch not a multiple of 8, input_dim not a
    # multiple of 128) to exercise the clipped boundary block + full-D block path.
    batch, input_dim = 10, 40
    x = jax.random.normal(kx, (batch, input_dim), jnp.float32)
    w1_t, b1, w2_t, b2 = init_params(kp, input_dim)
    ref = ref_fwd(x, w1_t, b1, w2_t, b2)

    # Default path: bf16 MXU operands, fp32 accumulate, fp32 output.
    out = jax.block_until_ready(two_layer_256_relu(x, w1_t, b1, w2_t, b2))
    assert out.shape == (batch, OUTPUT) and out.dtype == jnp.float32
    assert jnp.allclose(out, ref, atol=5e-2, rtol=5e-2)

    # Bit-faithful fp32 path (tight tolerance).
    out32 = jax.block_until_ready(
        two_layer_256_relu(x, w1_t, b1, w2_t, b2, use_bf16=False))
    assert jnp.allclose(out32, ref, atol=1e-4, rtol=1e-4)

    # Optional bf16 output (halves the dominant HBM write at small D).
    out_b16 = jax.block_until_ready(
        two_layer_256_relu(x, w1_t, b1, w2_t, b2, out_dtype=jnp.bfloat16))
    assert out_b16.dtype == jnp.bfloat16
    assert jnp.allclose(out_b16.astype(jnp.float32), ref, atol=5e-2, rtol=5e-2)

    # K-tiled (streamed-W1) path used for large D under the v7x VMEM budget; force it
    # here with a small block_d to validate the accumulator/init/finalize logic.
    batch2, input_dim2 = 12, 384
    x2 = jax.random.normal(kx2, (batch2, input_dim2), jnp.float32)
    p2 = init_params(kp2, input_dim2)
    ref2 = ref_fwd(x2, *p2)
    out_k = jax.block_until_ready(
        two_layer_256_relu(x2, *p2, block_d=128, use_bf16=False))
    assert out_k.shape == (batch2, OUTPUT)
    assert jnp.allclose(out_k, ref2, atol=1e-4, rtol=1e-4)

    print("KERNEL_OK")
</pallas_src>

<mosaic_0001>
module attributes {stable_mosaic.version = 11 : i64} {
  func.func @_mlp_kernel(%arg0: i32, %arg1: memref<10x40xf32, #tpu.memory_space<vmem>>, %arg2: memref<40x256xbf16, #tpu.memory_space<vmem>>, %arg3: memref<1x256xf32, #tpu.memory_space<vmem>>, %arg4: memref<256x256xbf16, #tpu.memory_space<vmem>>, %arg5: memref<1x256xf32, #tpu.memory_space<vmem>>, %arg6: memref<10x256xf32, #tpu.memory_space<vmem>>) attributes {dimension_semantics = [#tpu.dimension_semantics<parallel>], iteration_bounds = array<i64: 1>, scalar_prefetch = 0 : i64, scratch_operands = 0 : i64, tpu.core_type = #tpu.core_type<tc>, window_params = [{transform_indices = @transform_0, window_bounds = array<i64: 10, 40>}, {pipeline_mode = #tpu.pipeline_mode<synchronous>, transform_indices = @transform_1, window_bounds = array<i64: 40, 256>}, {pipeline_mode = #tpu.pipeline_mode<synchronous>, transform_indices = @transform_2, window_bounds = array<i64: 1, 256>}, {pipeline_mode = #tpu.pipeline_mode<synchronous>, transform_indices = @transform_3, window_bounds = array<i64: 256, 256>}, {pipeline_mode = #tpu.pipeline_mode<synchronous>, transform_indices = @transform_4, window_bounds = array<i64: 1, 256>}, {transform_indices = @transform_5, window_bounds = array<i64: 10, 256>}]} {
    %c0 = arith.constant 0 : index
    %c0_0 = arith.constant 0 : index
    %0 = vector.load %arg1[%c0, %c0_0] : memref<10x40xf32, #tpu.memory_space<vmem>>, vector<10x40xf32>
    %1 = arith.truncf %0 : vector<10x40xf32> to vector<10x40xbf16>
    %c0_1 = arith.constant 0 : index
    %c0_2 = arith.constant 0 : index
    %2 = vector.load %arg2[%c0_1, %c0_2] : memref<40x256xbf16, #tpu.memory_space<vmem>>, vector<40x256xbf16>
    %cst = arith.constant dense<0.000000e+00> : vector<10x256xf32>
    %3 = tpu.matmul %1, %2, %cst {dimension_numbers = #tpu.dot_dimension_numbers<[1], [0], [0], [1], [0, 0, 1, 1], [], []>} : vector<10x40xbf16>, vector<40x256xbf16>, vector<10x256xf32> -> vector<10x256xf32>
    %c0_3 = arith.constant 0 : index
    %c0_4 = arith.constant 0 : index
    %4 = vector.load %arg3[%c0_3, %c0_4] : memref<1x256xf32, #tpu.memory_space<vmem>>, vector<1x256xf32>
    %5 = vector.broadcast %4 : vector<1x256xf32> to vector<10x256xf32>
    %6 = arith.addf %3, %5 : vector<10x256xf32>
    %cst_5 = arith.constant 0.000000e+00 : f32
    %7 = vector.broadcast %cst_5 : f32 to vector<10x256xf32>
    %8 = arith.maximumf %6, %7 : vector<10x256xf32>
    %9 = arith.truncf %8 : vector<10x256xf32> to vector<10x256xbf16>
    %c0_6 = arith.constant 0 : index
    %c0_7 = arith.constant 0 : index
    %10 = vector.load %arg4[%c0_6, %c0_7] : memref<256x256xbf16, #tpu.memory_space<vmem>>, vector<256x256xbf16>
    %cst_8 = arith.constant dense<0.000000e+00> : vector<10x256xf32>
    %11 = tpu.matmul %9, %10, %cst_8 {dimension_numbers = #tpu.dot_dimension_numbers<[1], [0], [0], [1], [0, 0, 1, 1], [], []>} : vector<10x256xbf16>, vector<256x256xbf16>, vector<10x256xf32> -> vector<10x256xf32>
    %c0_9 = arith.constant 0 : index
    %c0_10 = arith.constant 0 : index
    %12 = vector.load %arg5[%c0_9, %c0_10] : memref<1x256xf32, #tpu.memory_space<vmem>>, vector<1x256xf32>
    %13 = vector.broadcast %12 : vector<1x256xf32> to vector<10x256xf32>
    %14 = arith.addf %11, %13 : vector<10x256xf32>
    %cst_11 = arith.constant 0.000000e+00 : f32
    %15 = vector.broadcast %cst_11 : f32 to vector<10x256xf32>
    %16 = arith.maximumf %14, %15 : vector<10x256xf32>
    %c0_12 = arith.constant 0 : index
    %c0_13 = arith.constant 0 : index
    %17 = vector.load %arg6[%c0_12, %c0_13] : memref<10x256xf32, #tpu.memory_space<vmem>>, vector<10x256xf32>
    tpu.vector_store %arg6[%c0_12, %c0_13], %16 {strides = array<i32>} : memref<10x256xf32, #tpu.memory_space<vmem>>, vector<10x256xf32>,
    return
  }
  func.func @transform_0(%arg0: i32) -> (i32, i32) {
    %c0_i32 = arith.constant 0 : i32
    %c0_i32_0 = arith.constant 0 : i32
    return %arg0, %c0_i32 : i32, i32
  }
  func.func @transform_1(%arg0: i32) -> (i32, i32) {
    %c0_i32 = arith.constant 0 : i32
    %c0_i32_0 = arith.constant 0 : i32
    %c0_i32_1 = arith.constant 0 : i32
    return %c0_i32, %c0_i32_0 : i32, i32
  }
  func.func @transform_2(%arg0: i32) -> (i32, i32) {
    %c0_i32 = arith.constant 0 : i32
    %c0_i32_0 = arith.constant 0 : i32
    %c0_i32_1 = arith.constant 0 : i32
    return %c0_i32, %c0_i32_0 : i32, i32
  }
  func.func @transform_3(%arg0: i32) -> (i32, i32) {
    %c0_i32 = arith.constant 0 : i32
    %c0_i32_0 = arith.constant 0 : i32
    %c0_i32_1 = arith.constant 0 : i32
    return %c0_i32, %c0_i32_0 : i32, i32
  }
  func.func @transform_4(%arg0: i32) -> (i32, i32) {
    %c0_i32 = arith.constant 0 : i32
    %c0_i32_0 = arith.constant 0 : i32
    %c0_i32_1 = arith.constant 0 : i32
    return %c0_i32, %c0_i32_0 : i32, i32
  }
  func.func @transform_5(%arg0: i32) -> (i32, i32) {
    %c0_i32 = arith.constant 0 : i32
    %c0_i32_0 = arith.constant 0 : i32
    return %arg0, %c0_i32 : i32, i32
  }
}

</mosaic_0001>

<bundles_post_ra>
// kernel: two_layer_256_relu.1
= control target key start
LH: loop header
LB: loop body
LE: loop exit
PB: predicated region body
PF: predicated region fallthrough
CT: control target
= control target key end

     0   :  { %vm65_vm0 = vcmask 1043456   ;;  %vm61_vm1 = vcmask 326656   ;;  %s864_s0 = inlined_call_operand.vmem [shape: f32[10,40], index: 0, kind: input, shape index: {}]   ;;  %s865_s1 = inlined_call_operand.vmem [shape: bf16[40,256], index: 1, kind: input, shape index: {}]   ;;  %s866_s2 = inlined_call_operand.vmem [shape: f32[1,256], index: 2, kind: input, shape index: {}]   ;;  %s867_s3 = inlined_call_operand.vmem [shape: bf16[256,256], index: 3, kind: input, shape index: {}]   ;;  %s868_s4 = inlined_call_operand.vmem [shape: f32[1,256], index: 4, kind: input, shape index: {}]   ;;  %s869_s5 = inlined_call_operand.hbm [shape: f32[10,256], index: 5, kind: output, shape index: {}]  }
   0x1   :  { %v29_v0 = vld [vmem:[%s865_s1 + $0x20] sm:$0xff]  ;;  %v396_v3 = vld [vmem:[%s865_s1 + $0x10] sm:$0xf]  ;;  %v535_v4 = vld [vmem:[%s865_s1 + $0x14] sm:$0xf0] }
   0x2   :  { %v49_v1 = vunpack.c.l.b16 %v29_v0  ;;  %v50_v2 = vunpack.c.h.b16 %v29_v0  ;;  %v534_v7 = vld [vmem:[%s865_s1 + $0x14] sm:$0xf]  ;;  %v398_v8 = vld [vmem:[%s865_s1 + $0x18] sm:$0xf0]  ;;  %v462_v9 = vld [vmem:[%s867_s3 + $0x70] sm:$0xf]  ;;  %v397_v19 = vor.u32 %v535_v4, %v396_v3 }
   0x3   :  { %v551_v10 = vld [vmem:[%s867_s3 + $0x74] sm:$0xf0]  ;;  %v526_v11 = vld [vmem:[%s867_s3 + $0xf0] sm:$0xf]  ;;  %v388_v14 = vld [vmem:[%s865_s1] sm:$0xf]  ;;  %v401_v20 = vor.u32 %v534_v7, %v398_v8 }
   0x4   :  { %v55_v5 = vpack.c.b16 %v49_v1, %v49_v1  ;;  %v56_v6 = vpack.c.b16 %v50_v2, %v50_v2  ;;  %v533_v15 = vld [vmem:[%s865_s1 + $0x4] sm:$0xf0]  ;;  %v532_v16 = vld [vmem:[%s865_s1 + $0x4] sm:$0xf]  ;;  %v463_v17 = vor.u32 %v551_v10, %v462_v9  ;;  %v567_v18 = vld [vmem:[%s867_s3 + $0xf4] sm:$0xf0] }
   0x5   :  { %v390_v21 = vld [vmem:[%s865_s1 + $0x8] sm:$0xf0]  ;;  %v527_v22 = vor.u32 %v567_v18, %v526_v11  ;;  %v550_v23 = vld [vmem:[%s867_s3 + $0x74] sm:$0xf]  ;;  %v464_v24 = vld [vmem:[%s867_s3 + $0x78] sm:$0xf0]  ;;  %v389_v36 = vor.u32 %v533_v15, %v388_v14 }
   0x6   :  { %v67_v12 = vsel %vm65_vm0, %v55_v5, 0  ;;  %v70_v13 = vsel %vm65_vm0, %v56_v6, 0  ;;  %304 = vmatpush.bf16.msra.mxu2 %v463_v17  ;;  %v454_v25 = vld [vmem:[%s867_s3 + $0x60] sm:$0xf]  ;;  %v549_v26 = vld [vmem:[%s867_s3 + $0x64] sm:$0xf0]  ;;  %v393_v37 = vor.u32 %v532_v16, %v390_v21  ;;  %v467_v41 = vor.u32 %v550_v23, %v464_v24 }
   0x7   :  { %77 = vmatpush.bf16.msra.mxu0 %v67_v12  ;;  %91 = vmatpush.bf16.msra.mxu1 %v70_v13  ;;  %v518_v27 = vld [vmem:[%s867_s3 + $0xe0] sm:$0xf]  ;;  %v566_v28 = vld [vmem:[%s867_s3 + $0xf4] sm:$0xf]  ;;  %v528_v29 = vld [vmem:[%s867_s3 + $0xf8] sm:$0xf0]  ;;  %v455_v30 = vor.u32 %v549_v26, %v454_v25 }
   0x8   :  { %318 = vmatpush.bf16.msra.mxu3 %v527_v22  ;;  %v565_v31 = vld [vmem:[%s867_s3 + $0xe4] sm:$0xf0]  ;;  %v22_v32 = vld [vmem:[%s864_s0] sm:$0xff]  ;;  %v446_v35 = vld [vmem:[%s867_s3 + $0x50] sm:$0xf]  ;;  %v531_v42 = vor.u32 %v566_v28, %v528_v29 }
   0x9   :  { %v23_v33 = vld [vmem:[%s864_s0 + $0x8] sm:$0x3]  ;;  %v519_v34 = vor.u32 %v565_v31, %v518_v27  ;;  %v547_v38 = vld [vmem:[%s867_s3 + $0x54] sm:$0xf0]  ;;  %v510_v39 = vld [vmem:[%s867_s3 + $0xd0] sm:$0xf] }
   0xa   :  { %v563_v40 = vld [vmem:[%s867_s3 + $0xd4] sm:$0xf0]  ;;  %305 = vmatpush.bf16.msra.mxu2 %v455_v30  ;;  %v548_v43 = vld [vmem:[%s867_s3 + $0x64] sm:$0xf]  ;;  %v456_v44 = vld [vmem:[%s867_s3 + $0x68] sm:$0xf0]  ;;  %v447_v47 = vor.u32 %v547_v38, %v446_v35  ;;  %v24_v50 = vpack.c.bf16 %v23_v33, %v22_v32 }
   0xb   :  { %78 = vmatpush.bf16.msra.mxu0 %v397_v19  ;;  %92 = vmatpush.bf16.msra.mxu1 %v401_v20  ;;  %v564_v45 = vld [vmem:[%s867_s3 + $0xe4] sm:$0xf]  ;;  %v520_v46 = vld [vmem:[%s867_s3 + $0xe8] sm:$0xf0]  ;;  %v511_v48 = vor.u32 %v563_v40, %v510_v39  ;;  %v438_v49 = vld [vmem:[%s867_s3 + $0x40] sm:$0xf]  ;;  %v459_v54 = vor.u32 %v548_v43, %v456_v44 }
   0xc   :  { %319 = vmatpush.bf16.msra.mxu3 %v519_v34  ;;  %v545_v51 = vld [vmem:[%s867_s3 + $0x44] sm:$0xf0]  ;;  %v502_v52 = vld [vmem:[%s867_s3 + $0xc0] sm:$0xf]  ;;  %v523_v55 = vor.u32 %v564_v45, %v520_v46  ;;  %v546_v56 = vld [vmem:[%s867_s3 + $0x54] sm:$0xf] }
   0xd   :  { %v561_v53 = vld [vmem:[%s867_s3 + $0xc4] sm:$0xf0] }
   0xf   :  { %79 = vmatpush.bf16.msra.mxu0 %v389_v36  ;;  %93 = vmatpush.bf16.msra.mxu1 %v393_v37 }
  0x13   :  { %332 = vmatpush.bf16.msrb.mxu0 %v467_v41  ;;  %346 = vmatpush.bf16.msrb.mxu1 %v531_v42 }
  0x14   :  { %10 = vsyncpa [#allocation3], 0  ;;  %306 = vmatpush.bf16.msra.mxu2 %v447_v47  ;;  %320 = vmatpush.bf16.msra.mxu3 %v511_v48  ;;  %v448_v57 = vld [vmem:[%s867_s3 + $0x58] sm:$0xf0]  ;;  %v562_v58 = vld [vmem:[%s867_s3 + $0xd4] sm:$0xf]  ;;  %v439_v60 = vor.u32 %v545_v51, %v438_v49  ;;  %v503_v61 = vor.u32 %v561_v53, %v502_v52 }
  0x15   :  { %v512_v59 = vld [vmem:[%s867_s3 + $0xd8] sm:$0xf0]  ;;  %402 = vmatmul.msk.bf16.vlgmr.msra.gmra.mxu0 %vm61_vm1, %v24_v50  ;;  %403 = vmatmul.msk.bf16.vlgmr.msra.gmra.mxu1 %vm61_vm1, %v24_v50  ;;  %v451_v62 = vor.u32 %v546_v56, %v448_v57  ;;  %v544_v0 = vld [vmem:[%s867_s3 + $0x44] sm:$0xf]  ;;  %v440_v1 = vld [vmem:[%s867_s3 + $0x48] sm:$0xf0] }
  0x16   :  { %v515_v63 = vor.u32 %v562_v58, %v512_v59  ;;  %v560_v2 = vld [vmem:[%s867_s3 + $0xc4] sm:$0xf]  ;;  %v504_v3 = vld [vmem:[%s867_s3 + $0xc8] sm:$0xf0]  ;;  %v443_v4 = vor.u32 %v544_v0, %v440_v1  ;;  %v430_v6 = vld [vmem:[%s867_s3 + $0x30] sm:$0xf] }
  0x17   :  { %333 = vmatpush.bf16.msrb.mxu0 %v459_v54  ;;  %347 = vmatpush.bf16.msrb.mxu1 %v523_v55  ;;  %v507_v5 = vor.u32 %v560_v2, %v504_v3  ;;  %v543_v7 = vld [vmem:[%s867_s3 + $0x34] sm:$0xf0]  ;;  %v494_v8 = vld [vmem:[%s867_s3 + $0xb0] sm:$0xf]  ;;  %v542_v11 = vld [vmem:[%s867_s3 + $0x34] sm:$0xf] }
  0x18   :  { %307 = vmatpush.bf16.msra.mxu2 %v439_v60  ;;  %321 = vmatpush.bf16.msra.mxu3 %v503_v61  ;;  %v431_v9 = vor.u32 %v543_v7, %v430_v6  ;;  %v559_v10 = vld [vmem:[%s867_s3 + $0xb4] sm:$0xf0]  ;;  %v432_v12 = vld [vmem:[%s867_s3 + $0x38] sm:$0xf0]  ;;  %v558_v15 = vld [vmem:[%s867_s3 + $0xb4] sm:$0xf] }
  0x19   :  { %v495_v13 = vor.u32 %v559_v10, %v494_v8  ;;  %v435_v14 = vor.u32 %v542_v11, %v432_v12  ;;  %v496_v16 = vld [vmem:[%s867_s3 + $0xb8] sm:$0xf0]  ;;  %v422_v18 = vld [vmem:[%s867_s3 + $0x20] sm:$0xf]  ;;  %v541_v19 = vld [vmem:[%s867_s3 + $0x24] sm:$0xf0] }
  0x1a   :  { %v499_v17 = vor.u32 %v558_v15, %v496_v16  ;;  %v423_v20 = vor.u32 %v541_v19, %v422_v18  ;;  %v486_v21 = vld [vmem:[%s867_s3 + $0xa0] sm:$0xf]  ;;  %v557_v22 = vld [vmem:[%s867_s3 + $0xa4] sm:$0xf0]  ;;  %v540_v23 = vld [vmem:[%s867_s3 + $0x24] sm:$0xf] }
  0x1b   :  { %334 = vmatpush.bf16.msrb.mxu0 %v451_v62  ;;  %348 = vmatpush.bf16.msrb.mxu1 %v515_v63  ;;  %v487_v24 = vor.u32 %v557_v22, %v486_v21  ;;  %v424_v25 = vld [vmem:[%s867_s3 + $0x28] sm:$0xf0]  ;;  %v556_v26 = vld [vmem:[%s867_s3 + $0xa4] sm:$0xf]  ;;  %v414_v30 = vld [vmem:[%s867_s3 + $0x10] sm:$0xf] }
  0x1c   :  { %308 = vmatpush.bf16.msra.mxu2 %v431_v9  ;;  %322 = vmatpush.bf16.msra.mxu3 %v495_v13  ;;  %v488_v27 = vld [vmem:[%s867_s3 + $0xa8] sm:$0xf0]  ;;  %v427_v28 = vor.u32 %v540_v23, %v424_v25  ;;  %v539_v31 = vld [vmem:[%s867_s3 + $0x14] sm:$0xf0]  ;;  %v478_v32 = vld [vmem:[%s867_s3 + $0x90] sm:$0xf] }
  0x1d   :  { %v491_v29 = vor.u32 %v556_v26, %v488_v27  ;;  %v415_v33 = vor.u32 %v539_v31, %v414_v30  ;;  %v555_v34 = vld [vmem:[%s867_s3 + $0x94] sm:$0xf0]  ;;  %v538_v35 = vld [vmem:[%s867_s3 + $0x14] sm:$0xf]  ;;  %v416_v36 = vld [vmem:[%s867_s3 + $0x18] sm:$0xf0] }
  0x1e   :  { %v479_v37 = vor.u32 %v555_v34, %v478_v32  ;;  %v419_v38 = vor.u32 %v538_v35, %v416_v36  ;;  %v554_v39 = vld [vmem:[%s867_s3 + $0x94] sm:$0xf]  ;;  %v480_v40 = vld [vmem:[%s867_s3 + $0x98] sm:$0xf0]  ;;  %v406_v42 = vld [vmem:[%s867_s3] sm:$0xf] }
  0x1f   :  { %335 = vmatpush.bf16.msrb.mxu0 %v443_v4  ;;  %349 = vmatpush.bf16.msrb.mxu1 %v507_v5  ;;  %v483_v41 = vor.u32 %v554_v39, %v480_v40  ;;  %v537_v43 = vld [vmem:[%s867_s3 + $0x4] sm:$0xf0]  ;;  %v470_v44 = vld [vmem:[%s867_s3 + $0x80] sm:$0xf]  ;;  %v536_v47 = vld [vmem:[%s867_s3 + $0x4] sm:$0xf] }
  0x20   :  { %309 = vmatpush.bf16.msra.mxu2 %v423_v20  ;;  %323 = vmatpush.bf16.msra.mxu3 %v487_v24  ;;  %v407_v45 = vor.u32 %v537_v43, %v406_v42  ;;  %v553_v46 = vld [vmem:[%s867_s3 + $0x84] sm:$0xf0]  ;;  %v408_v48 = vld [vmem:[%s867_s3 + $0x8] sm:$0xf0]  ;;  %v552_v51 = vld [vmem:[%s867_s3 + $0x84] sm:$0xf] }
  0x21   :  { %v471_v49 = vor.u32 %v553_v46, %v470_v44  ;;  %v411_v50 = vor.u32 %v536_v47, %v408_v48  ;;  %v472_v52 = vld [vmem:[%s867_s3 + $0x88] sm:$0xf0]  ;;  %v30_v54 = vld [vmem:[%s866_s2] sm:$0x3]  ;;  %s374_s14 = sshll.u32 %s869_s5, 4  ;;  %s598_s15 = smov 256   ;;  %s375_s14 = int_to_ptr.hbm [resolvable:$true] %s374_s14 }
  0x22   :  { %v475_v53 = vor.u32 %v552_v51, %v472_v52  ;;  %v32_v57 = vperm.slane %v30_v54, 0  ;;  %v33_v58 = vperm.slane %v30_v54, 1  ;;  %v138_v7 = vld [vmem:[%s868_s4] sm:$0x3]  ;;  %s597_s4 = smov [#allocation2]   ;;  %s599_s16 = smov 16  }
  0x23   :  { %336 = vmatpush.bf16.msrb.mxu0 %v435_v14  ;;  %350 = vmatpush.bf16.msrb.mxu1 %v499_v17  ;;  %v141_v8 = vperm.slane %v138_v7, 1  ;;  %v140_v12 = vperm.slane %v138_v7, 0  ;;  %s372_s11 = sshll.u32 %s597_s4, 4  ;;  %s373_s11 = int_to_ptr.vmem [resolvable:$true] %s372_s11 }
  0x24   :  { %310 = vmatpush.bf16.msra.mxu2 %v415_v33  ;;  %324 = vmatpush.bf16.msra.mxu3 %v479_v37 }
  0x27   :  { %337 = vmatpush.bf16.msrb.mxu0 %v427_v28  ;;  %351 = vmatpush.bf16.msrb.mxu1 %v491_v29 }
  0x28   :  { %311 = vmatpush.bf16.msra.mxu2 %v407_v45  ;;  %325 = vmatpush.bf16.msra.mxu3 %v471_v49 }
  0x2b   :  { %338 = vmatpush.bf16.msrb.mxu0 %v419_v38  ;;  %352 = vmatpush.bf16.msrb.mxu1 %v483_v41 }
  0x2f   :  { %339 = vmatpush.bf16.msrb.mxu0 %v411_v50  ;;  %353 = vmatpush.bf16.msrb.mxu1 %v475_v53 }
  0x92   :  { %v81_v55 = vpop.f32.mrf.mxu0  ;;  %v95_v56 = vpop.f32.mrf.mxu1 }
  0x93   :  { %v82_v59 = vadd.f32 %v81_v55, %v32_v57  ;;  %v96_v60 = vadd.f32 %v95_v56, %v33_v58 }
  0x95   :  { %v100_v1 = vmax.f32 %v82_v59, 0.0  ;;  %v101_v2 = vmax.f32 %v96_v60, 0.0 }
  0x9a   :  { %v83_v61 = vpop.f32.mrf.mxu0  ;;  %v97_v62 = vpop.f32.mrf.mxu1 }
  0x9b   :  { %v84_v63 = vadd.f32 %v83_v61, %v32_v57  ;;  %v98_v0 = vadd.f32 %v97_v62, %v33_v58 }
  0x9d   :  { %v102_v3 = vmax.f32 %v84_v63, 0.0  ;;  %v103_v4 = vmax.f32 %v98_v0, 0.0 }
  0x9f   :  { %v104_v5 = vpack.c.bf16 %v102_v3, %v100_v1  ;;  %v105_v6 = vpack.c.bf16 %v103_v4, %v101_v2 }
  0xa1   :  { %312 = vmatmul.bf16.vlgmr.msra.gmra.mxu2 %v104_v5  ;;  %326 = vmatmul.bf16.vlgmr.msra.gmra.mxu3 %v105_v6 }
  0xa2   :  { %340 = vmatmul.bf16.vlgmr.msrb.gmra.mxu0 %v104_v5  ;;  %354 = vmatmul.bf16.vlgmr.msrb.gmra.mxu1 %v105_v6 }
 0x11f   :  { %v341_v9 = vpop.f32.mrf.mxu0  ;;  %v355_v10 = vpop.f32.mrf.mxu1 }
 0x120   :  { %v342_v11 = vadd.f32 %v341_v9, %v141_v8 }
 0x122   :  { %v356_v13 = vadd.f32 %v355_v10, %v342_v11 }
 0x124   :  { %v361_v14 = vmax.f32 %v356_v13, 0.0  ;;  %v313_v15 = vpop.f32.mrf.mxu2  ;;  %v327_v16 = vpop.f32.mrf.mxu3 }
 0x125   :  { %v314_v17 = vadd.f32 %v313_v15, %v140_v12 }
 0x126   :  { %365 = vst [vmem:[#allocation2 + $0x8] sm:$0xff] %v361_v14 }
 0x127   :  { %v328_v18 = vadd.f32 %v327_v16, %v314_v17  ;;  %v343_v19 = vpop.f32.mrf.mxu0  ;;  %v357_v22 = vpop.f32.mrf.mxu1 }
 0x128   :  { %v344_v20 = vadd.f32 %v343_v19, %v141_v8 }
 0x129   :  { %v360_v21 = vmax.f32 %v328_v18, 0.0 }
 0x12a   :  { %v358_v23 = vadd.f32 %v357_v22, %v344_v20 }
 0x12b   :  { %364 = vst [vmem:[#allocation2] sm:$0xff] %v360_v21 }
 0x12c   :  { %v363_v24 = vmax.f32 %v358_v23, 0.0  ;;  %v315_v25 = vpop.f32.mrf.mxu2  ;;  %v329_v27 = vpop.f32.mrf.mxu3 }
 0x12d   :  { %v316_v26 = vadd.f32 %v315_v25, %v140_v12 }
 0x12e   :  { %367 = vst [vmem:[#allocation2 + $0x18] sm:$0x3] %v363_v24 }
 0x12f   :  { %v330_v28 = vadd.f32 %v329_v27, %v316_v26 }
 0x131   :  { %v362_v29 = vmax.f32 %v330_v28, 0.0 }
 0x133   :  { %366 = vst [vmem:[#allocation2 + $0x10] sm:$0x3] %v362_v29 }
 0x134   :  { %380 = dma.vmem_to_hbm [thread:$0]  %s373_s11, 512, %s375_s14, [#allocation3], %s598_s15, %s598_s15, %s599_s16  }
 0x135   :  { %595 = dma.done.wait [#allocation3], 512  }
 0x136   :  { %596 = vsyncadd [#allocation3], 4294966784 }
 0x137   :  { %385 = vsyncpa [#allocation3], 1 }

</bundles_post_ra>
